<compile_context>
chip_gen: v7x
topology: tpu7x:2x2x1
jax: 0.10.0
libtpu: 0.0.40
codegen_flags: <defaults>
</compile_context>

<pallas_src>
import functools

import jax
import jax.numpy as jnp
from jax.experimental import pallas as pl
from jax.experimental.pallas import tpu as pltpu


def _round_up(n, m):
    return ((n + m - 1) // m) * m


def _device_kind():
    try:
        return jax.devices()[0].device_kind.lower()
    except Exception:  # pragma: no cover - defensive (e.g. no devices yet)
        return ""


def regression_head_kernel(x_ref, w1_ref, b1_ref, w2_ref, b2_ref, o_ref, *, act_dtype):
    # x_ref:  [TB, H]   original activation dtype (cast here, not in the wrapper)
    # w1_ref: [H, HP]   compute dtype (K = real H -> x needs no lane padding)
    # b1_ref: [1, HP]   f32
    # w2_ref: [HP, LP]  compute dtype
    # b2_ref: [1, LP]   f32
    # o_ref:  [TB, LP]  compute dtype (lane-dense 128-wide store)
    x = x_ref[...].astype(w1_ref.dtype)

    # dense: MXU matmul with f32 accumulation; bias-add on the f32 accumulator.
    h = jnp.dot(x, w1_ref[...], preferred_element_type=jnp.float32) + b1_ref[...]
    # tanh in bf16 on v6e/v7x (native bf16 EUP, ~2x rate); f32 on v5e.
    h = jnp.tanh(h.astype(act_dtype)).astype(w2_ref.dtype)

    # out_proj: second MXU pass, f32 accumulation.
    y = jnp.dot(h, w2_ref[...], preferred_element_type=jnp.float32) + b2_ref[...]
    o_ref[...] = y.astype(o_ref.dtype)


def prepare_params(dense_w, dense_b, out_w, out_b, *, compute_dtype=jnp.bfloat16):
    """One-time weight prep (NOT on the per-forward hot path).

    dense_w: [H, H] (PyTorch [out, in]); dense_b: [H]
    out_w:   [L, H] (PyTorch [out, in]); out_b:   [L]

    Returns (w1, b1, w2, b2):
      w1: [H, HP]  compute_dtype, transposed to [in, out], out-dim zero-padded
      b1: [1, HP]  f32
      w2: [HP, LP] compute_dtype, transposed to [in, out], zero-padded
      b2: [1, LP]  f32
    with HP = round_up(H, 128), LP = round_up(L, 128)  (lane-dense).
    """
    H = dense_w.shape[1]
    L = out_w.shape[0]
    HP = _round_up(H, 128)
    LP = _round_up(L, 128)

    w1 = jnp.zeros((H, HP), compute_dtype).at[:, :H].set(dense_w.T.astype(compute_dtype))
    b1 = jnp.zeros((1, HP), jnp.float32).at[0, :H].set(dense_b.astype(jnp.float32))
    w2 = jnp.zeros((HP, LP), compute_dtype).at[:H, :L].set(out_w.T.astype(compute_dtype))
    b2 = jnp.zeros((1, LP), jnp.float32).at[0, :L].set(out_b.astype(jnp.float32))
    return w1, b1, w2, b2


def regression_head(features, w1, b1, w2, b2, *, num_labels, batch_tile=512):
    """features: [..., H]. Returns [..., num_labels] in features.dtype."""
    orig_shape = features.shape
    H = orig_shape[-1]
    x = features.reshape(-1, H)
    B = x.shape[0]

    assert w1.shape[0] == H, "w1 must be [H, HP] (use prepare_params)"
    HP = w1.shape[1]
    LP = w2.shape[1]
    compute_dtype = w1.dtype
    out_dtype = compute_dtype  # bf16 path: halves the padded output writeback

    kind = _device_kind()
    # v5e has no bf16 VPU/EUP -> keep the tanh in f32 there.
    act_dtype = jnp.float32 if "v5" in kind else compute_dtype

    # Batch tile: target >= 2 tiles (pipelining / v7x megacore), rounded to the
    # sublane packing of the compute dtype (16 for bf16, 8 for f32), capped by
    # batch_tile, and never larger than the (8-aligned) batch so every block
    # shape stays valid.  cdiv grid -> partial last block, no B padding.
    sub = {2: 16, 1: 32}.get(jnp.dtype(compute_dtype).itemsize, 8)
    ntiles_target = max(2, pl.cdiv(B, batch_tile))
    TB = max(sub, min(_round_up(pl.cdiv(B, ntiles_target), sub), batch_tile))
    if B >= 8:
        TB = min(TB, (B // 8) * 8)   # keep the block within the array
    else:
        TB = B                       # tiny batch: block == full dim (allowed)
    grid = pl.cdiv(B, TB)

    # v7x: split tiles across the two TensorCores when the grid allows it.
    if "v7" in kind and grid >= 2 and grid % 2 == 0:
        semantics = (pltpu.CORE_PARALLEL,)
    else:
        semantics = ("parallel",)

    # Explicit VMEM budget: x/out double-buffered, resident params
    # single-buffered (Buffered(1)), plus the f32 intermediate. Clamp to the
    # smallest physical VMEM (v7x: 64 MiB), floor at 32 MiB (safe everywhere).
    x_it = jnp.dtype(x.dtype).itemsize
    w_it = jnp.dtype(compute_dtype).itemsize
    o_it = jnp.dtype(out_dtype).itemsize
    footprint = (2 * TB * H * x_it                    # x (double-buffered)
                 + H * HP * w_it + HP * 4             # w1 + b1 (single-buffered)
                 + HP * LP * w_it + LP * 4            # w2 + b2 (single-buffered)
                 + 2 * TB * LP * o_it                 # out (double-buffered)
                 + TB * HP * 4)                       # f32 intermediate
    vmem_limit = int(min(max(2 * footprint + (4 << 20), 32 << 20), 64 << 20))

    cost = pl.CostEstimate(
        flops=2 * B * H * HP + 2 * B * HP * LP,
        transcendentals=B * HP,
        bytes_accessed=(B * H * x_it + H * HP * w_it + HP * LP * w_it
                        + (HP + LP) * 4 + B * LP * o_it),
    )

    resident = dict(pipeline_mode=pl.Buffered(1))  # VMEM-resident, single buffer
    out = pl.pallas_call(
        functools.partial(regression_head_kernel, act_dtype=act_dtype),
        out_shape=jax.ShapeDtypeStruct((B, LP), out_dtype),
        grid=(grid,),
        in_specs=[
            pl.BlockSpec((TB, H), lambda i: (i, 0)),               # x: streamed
            pl.BlockSpec((H, HP), lambda i: (0, 0), **resident),   # w1
            pl.BlockSpec((1, HP), lambda i: (0, 0), **resident),   # b1
            pl.BlockSpec((HP, LP), lambda i: (0, 0), **resident),  # w2
            pl.BlockSpec((1, LP), lambda i: (0, 0), **resident),   # b2
        ],
        out_specs=pl.BlockSpec((TB, LP), lambda i: (i, 0)),
        compiler_params=pltpu.CompilerParams(
            dimension_semantics=semantics,
            vmem_limit_bytes=vmem_limit,
        ),
        cost_estimate=cost,
    )(x, w1, b1, w2, b2)

    out = out[:, :num_labels].astype(features.dtype)
    return out.reshape(orig_shape[:-1] + (num_labels,))


def _reference(features, dense_w, dense_b, out_w, out_b):
    h = jnp.tanh(features @ dense_w.T + dense_b)
    return h @ out_w.T + out_b


if __name__ == "__main__":
    # Small shapes consistent with the module: hidden_size=32, num_labels=4.
    B, H, L = 8, 32, 4
    key = jax.random.PRNGKey(0)
    k_x, k_w1, k_b1, k_w2, k_b2 = jax.random.split(key, 5)

    features = jax.random.normal(k_x, (B, H), dtype=jnp.float32)
    dense_w = jax.random.normal(k_w1, (H, H), dtype=jnp.float32) * 0.1
    dense_b = jax.random.normal(k_b1, (H,), dtype=jnp.float32) * 0.1
    out_w = jax.random.normal(k_w2, (L, H), dtype=jnp.float32) * 0.1
    out_b = jax.random.normal(k_b2, (L,), dtype=jnp.float32) * 0.1

    ref = _reference(features, dense_w, dense_b, out_w, out_b)

    # --- f32 MXU operand path (tight check) ---
    params_f32 = prepare_params(dense_w, dense_b, out_w, out_b,
                                compute_dtype=jnp.float32)
    fwd_f32 = jax.jit(lambda x: regression_head(x, *params_f32, num_labels=L))
    out_f32 = jax.block_until_ready(fwd_f32(features))
    assert out_f32.shape == (B, L)
    assert jnp.allclose(out_f32, ref, atol=2e-3, rtol=2e-3), "f32 path mismatch"

    # --- bf16 MXU operand path, f32 accumulation (looser check: bf16 rounding) ---
    params_bf16 = prepare_params(dense_w, dense_b, out_w, out_b,
                                 compute_dtype=jnp.bfloat16)
    fwd_bf16 = jax.jit(lambda x: regression_head(x, *params_bf16, num_labels=L))
    out_bf16 = jax.block_until_ready(fwd_bf16(features))
    assert out_bf16.shape == (B, L)
    assert jnp.allclose(out_bf16.astype(jnp.float32), ref,
                        atol=5e-2, rtol=5e-2), "bf16 path mismatch"

    # --- larger batch: multiple tiles + partial last block (cdiv grid path) ---
    B2 = 300
    features2 = jax.random.normal(jax.random.PRNGKey(1), (B2, H), dtype=jnp.float32)
    ref2 = _reference(features2, dense_w, dense_b, out_w, out_b)
    out2 = jax.block_until_ready(
        jax.jit(lambda x: regression_head(x, *params_bf16, num_labels=L))(features2))
    assert out2.shape == (B2, L)
    assert jnp.allclose(out2.astype(jnp.float32), ref2,
                        atol=5e-2, rtol=5e-2), "multi-tile bf16 path mismatch"

    print("KERNEL_OK")
</pallas_src>

<mosaic_0001>
module attributes {stable_mosaic.version = 11 : i64} {
  func.func @regression_head_kernel(%arg0: i32, %arg1: memref<8x32xf32, #tpu.memory_space<vmem>>, %arg2: memref<32x128xf32, #tpu.memory_space<vmem>>, %arg3: memref<1x128xf32, #tpu.memory_space<vmem>>, %arg4: memref<128x128xf32, #tpu.memory_space<vmem>>, %arg5: memref<1x128xf32, #tpu.memory_space<vmem>>, %arg6: memref<8x128xf32, #tpu.memory_space<vmem>>) attributes {dimension_semantics = [#tpu.dimension_semantics<parallel>], iteration_bounds = array<i64: 1>, scalar_prefetch = 0 : i64, scratch_operands = 0 : i64, tpu.core_type = #tpu.core_type<tc>, window_params = [{transform_indices = @transform_0, window_bounds = array<i64: 8, 32>}, {pipeline_mode = #tpu.pipeline_mode<synchronous>, transform_indices = @transform_1, window_bounds = array<i64: 32, 128>}, {pipeline_mode = #tpu.pipeline_mode<synchronous>, transform_indices = @transform_2, window_bounds = array<i64: 1, 128>}, {pipeline_mode = #tpu.pipeline_mode<synchronous>, transform_indices = @transform_3, window_bounds = array<i64: 128, 128>}, {pipeline_mode = #tpu.pipeline_mode<synchronous>, transform_indices = @transform_4, window_bounds = array<i64: 1, 128>}, {transform_indices = @transform_5, window_bounds = array<i64: 8, 128>}]} {
    %c0 = arith.constant 0 : index
    %c0_0 = arith.constant 0 : index
    %0 = vector.load %arg1[%c0, %c0_0] : memref<8x32xf32, #tpu.memory_space<vmem>>, vector<8x32xf32>
    %c0_1 = arith.constant 0 : index
    %c0_2 = arith.constant 0 : index
    %1 = vector.load %arg2[%c0_1, %c0_2] : memref<32x128xf32, #tpu.memory_space<vmem>>, vector<32x128xf32>
    %cst = arith.constant dense<0.000000e+00> : vector<8x128xf32>
    %2 = tpu.matmul %0, %1, %cst {dimension_numbers = #tpu.dot_dimension_numbers<[1], [0], [0], [1], [0, 0, 1, 1], [], []>} : vector<8x32xf32>, vector<32x128xf32>, vector<8x128xf32> -> vector<8x128xf32>
    %c0_3 = arith.constant 0 : index
    %c0_4 = arith.constant 0 : index
    %3 = vector.load %arg3[%c0_3, %c0_4] : memref<1x128xf32, #tpu.memory_space<vmem>>, vector<1x128xf32>
    %4 = vector.broadcast %3 : vector<1x128xf32> to vector<8x128xf32>
    %5 = arith.addf %2, %4 : vector<8x128xf32>
    %6 = math.tanh %5 : vector<8x128xf32>
    %c0_5 = arith.constant 0 : index
    %c0_6 = arith.constant 0 : index
    %7 = vector.load %arg4[%c0_5, %c0_6] : memref<128x128xf32, #tpu.memory_space<vmem>>, vector<128x128xf32>
    %cst_7 = arith.constant dense<0.000000e+00> : vector<8x128xf32>
    %8 = tpu.matmul %6, %7, %cst_7 {dimension_numbers = #tpu.dot_dimension_numbers<[1], [0], [0], [1], [0, 0, 1, 1], [], []>} : vector<8x128xf32>, vector<128x128xf32>, vector<8x128xf32> -> vector<8x128xf32>
    %c0_8 = arith.constant 0 : index
    %c0_9 = arith.constant 0 : index
    %9 = vector.load %arg5[%c0_8, %c0_9] : memref<1x128xf32, #tpu.memory_space<vmem>>, vector<1x128xf32>
    %10 = vector.broadcast %9 : vector<1x128xf32> to vector<8x128xf32>
    %11 = arith.addf %8, %10 : vector<8x128xf32>
    %c0_10 = arith.constant 0 : index
    %c0_11 = arith.constant 0 : index
    %12 = vector.load %arg6[%c0_10, %c0_11] : memref<8x128xf32, #tpu.memory_space<vmem>>, vector<8x128xf32>
    tpu.vector_store %arg6[%c0_10, %c0_11], %11 {strides = array<i32>} : memref<8x128xf32, #tpu.memory_space<vmem>>, vector<8x128xf32>,
    return
  }
  func.func @transform_0(%arg0: i32) -> (i32, i32) {
    %c0_i32 = arith.constant 0 : i32
    %c0_i32_0 = arith.constant 0 : i32
    return %arg0, %c0_i32 : i32, i32
  }
  func.func @transform_1(%arg0: i32) -> (i32, i32) {
    %c0_i32 = arith.constant 0 : i32
    %c0_i32_0 = arith.constant 0 : i32
    %c0_i32_1 = arith.constant 0 : i32
    return %c0_i32, %c0_i32_0 : i32, i32
  }
  func.func @transform_2(%arg0: i32) -> (i32, i32) {
    %c0_i32 = arith.constant 0 : i32
    %c0_i32_0 = arith.constant 0 : i32
    %c0_i32_1 = arith.constant 0 : i32
    return %c0_i32, %c0_i32_0 : i32, i32
  }
  func.func @transform_3(%arg0: i32) -> (i32, i32) {
    %c0_i32 = arith.constant 0 : i32
    %c0_i32_0 = arith.constant 0 : i32
    %c0_i32_1 = arith.constant 0 : i32
    return %c0_i32, %c0_i32_0 : i32, i32
  }
  func.func @transform_4(%arg0: i32) -> (i32, i32) {
    %c0_i32 = arith.constant 0 : i32
    %c0_i32_0 = arith.constant 0 : i32
    %c0_i32_1 = arith.constant 0 : i32
    return %c0_i32, %c0_i32_0 : i32, i32
  }
  func.func @transform_5(%arg0: i32) -> (i32, i32) {
    %c0_i32 = arith.constant 0 : i32
    %c0_i32_0 = arith.constant 0 : i32
    return %arg0, %c0_i32 : i32, i32
  }
}

</mosaic_0001>

<bundles_post_ra>
// kernel: _lambda_.1
= control target key start
LH: loop header
LB: loop body
LE: loop exit
PB: predicated region body
PF: predicated region fallthrough
CT: control target
= control target key end

     0   :  { %10 = vsyncpa [#allocation3], 0  ;;  %s516_s0 = inlined_call_operand.hbm [shape: f32[8,32], index: 0, kind: input, shape index: {}]   ;;  %s517_s1 = inlined_call_operand.hbm [shape: f32[32,128], index: 1, kind: input, shape index: {}]   ;;  %s518_s2 = inlined_call_operand.vmem [shape: f32[1,128], index: 2, kind: input, shape index: {}]   ;;  %s519_s3 = inlined_call_operand.hbm [shape: f32[128,128], index: 3, kind: input, shape index: {}]   ;;  %s520_s4 = inlined_call_operand.vmem [shape: f32[1,128], index: 4, kind: input, shape index: {}]   ;;  %s521_s5 = inlined_call_operand.vmem [shape: f32[8,128], index: 5, kind: output, shape index: {}]  }
   0x1   :  { %11 = vsyncpa [#allocation5], 0  ;;  %s427_s18 = smov [#allocation4]   ;;  %s357_s22 = scalar_lea.hbm %s517_s1, 512 }
   0x2   :  { %s27_s19 = sshll.u32 %s427_s18, 4  ;;  %p358_p0 = scmp.ne.s32.totalorder %s517_s1, %s357_s22  ;;  %s28_s19 = int_to_ptr.vmem [resolvable:$true] %s27_s19 }
   0x3   :  { %p361_p1 = scmp.lt.u32.totalorder %s357_s22, %s517_s1 }
   0x5   :  { %p363_p2 = pnand %p361_p1, %p358_p0 }
   0x7   :  { %366 = shalt.err (!%p363_p2)
}
   0x8   :  { %s367_s27 = scalar_lea.vmem %s28_s19, 512  ;;  %p372_p4 = scmp.lt.s32.totalorder %s28_s19, %s28_s19 }
   0x9   :  { %p368_p3 = scmp.ne.s32.totalorder %s28_s19, %s367_s27  ;;  %p373_p5 = scmp.lt.s32.totalorder %s367_s27, %s367_s27 }
   0xb   :  { %p374_p6 = por %p373_p5, %p372_p4 }
   0xd   :  { %p375_p7 = pnand %p374_p6, %p368_p3 }
   0xf   :  { %378 = shalt.err (!%p375_p7)
}
  0x10   :  { %s428_s28 = smov 128   ;;  %s429_s29 = smov 8  }
  0x11   :  { %33 = dma.hbm_to_vmem [thread:$0]  %s517_s1, 512, %s28_s19, [#allocation5], %s428_s28, %s428_s28, %s429_s29  }
  0x12   :  { %s430_s7 = smov [#allocation2]   ;;  %s431_s9 = smov [#allocation6]  }
  0x13   :  { %s18_s8 = sshll.u32 %s430_s7, 4  ;;  %s41_s10 = sshll.u32 %s431_s9, 4  ;;  %s19_s8 = int_to_ptr.vmem [resolvable:$true] %s18_s8  ;;  %s42_s10 = int_to_ptr.vmem [resolvable:$true] %s41_s10 }
  0x14   :  { %s379_s13 = scalar_lea.hbm %s516_s0, 128 }
  0x15   :  { %p380_p8 = scmp.ne.s32.totalorder %s516_s0, %s379_s13  ;;  %p383_p9 = scmp.lt.u32.totalorder %s379_s13, %s516_s0 }
  0x17   :  { %p385_p10 = pnand %p383_p9, %p380_p8 }
  0x19   :  { %388 = shalt.err (!%p385_p10)
}
  0x1a   :  { %s389_s1 = scalar_lea.vmem %s19_s8, 128  ;;  %p394_p12 = scmp.lt.s32.totalorder %s19_s8, %s19_s8 }
  0x1b   :  { %p390_p11 = scmp.ne.s32.totalorder %s19_s8, %s389_s1  ;;  %p395_p13 = scmp.lt.s32.totalorder %s389_s1, %s389_s1 }
  0x1d   :  { %p396_p0 = por %p395_p13, %p394_p12 }
  0x1f   :  { %p397_p1 = pnand %p396_p0, %p390_p11 }
  0x21   :  { %400 = shalt.err (!%p397_p1)
}
  0x22   :  { %21 = dma.hbm_to_vmem [thread:$0]  %s516_s0, 128, %s19_s8, [#allocation3]  }
  0x23   :  { %s401_s22 = scalar_lea.hbm %s519_s3, 2048 }
  0x24   :  { %p402_p2 = scmp.ne.s32.totalorder %s519_s3, %s401_s22  ;;  %p405_p3 = scmp.lt.u32.totalorder %s401_s22, %s519_s3 }
  0x26   :  { %p407_p4 = pnand %p405_p3, %p402_p2 }
  0x28   :  { %410 = shalt.err (!%p407_p4)
}
  0x29   :  { %s411_s27 = scalar_lea.vmem %s42_s10, 2048  ;;  %p416_p6 = scmp.lt.s32.totalorder %s42_s10, %s42_s10 }
  0x2a   :  { %p412_p5 = scmp.ne.s32.totalorder %s42_s10, %s411_s27  ;;  %p417_p7 = scmp.lt.s32.totalorder %s411_s27, %s411_s27 }
  0x2c   :  { %p418_p8 = por %p417_p7, %p416_p6 }
  0x2e   :  { %p419_p9 = pnand %p418_p8, %p412_p5 }
  0x30   :  { %422 = shalt.err (!%p419_p9)
}
  0x31   :  { %47 = dma.hbm_to_vmem [thread:$0]  %s519_s3, 2048, %s42_s10, [#allocation5], %s428_s28, %s428_s28, %s429_s29  }
  0x32   :  { %423 = dma.done.wait [#allocation3], 128  }
  0x33   :  { %424 = vsyncadd [#allocation3], 4294967168 }
  0x34   :  { %425 = dma.done.wait [#allocation5], 2560  }
  0x35   :  { %426 = vsyncadd [#allocation5], 4294964736  ;;  %v432_v0 = vmov 0.0|0.0   ;;  %vm433_vm0 = vmmov 0   ;;  %v434_v1 = vmov 0.0   ;;  %v60_v2 = vld [vmem:[#allocation4] sm:$0xff] }
  0x36   :  { %317 = vmatprep.subr.bf16.mxu0 %v432_v0  ;;  %279 = vmatprep.mubr.msk.f32.mxu0 %vm433_vm0, %v434_v1  ;;  %v61_v3 = vld [vmem:[#allocation4 + $0x8] sm:$0xff]  ;;  %v62_v4 = vld [vmem:[#allocation4 + $0x10] sm:$0xff]  ;;  %v63_v6 = vld [vmem:[#allocation4 + $0x18] sm:$0xff]  ;;  %vm71_vm1 = vcmask 261120  }
  0x37   :  { %323 = vmatprep.subr.bf16.mxu1 %v432_v0  ;;  %314 = vmatprep.mubr.msk.f32.mxu1 %vm433_vm0, %v434_v1  ;;  %v318_v5 = vpack.c.bf16 %v61_v3, %v60_v2  ;;  %v146_v7 = vld [vmem:[#allocation6] sm:$0xff]  ;;  %v147_v8 = vld [vmem:[#allocation6 + $0x8] sm:$0xff]  ;;  %v148_v9 = vld [vmem:[#allocation6 + $0x10] sm:$0xff]  ;;  %v321_v11 = vpack.c.bf16 %v63_v6, %v62_v4 }
  0x38   :  { %v149_v10 = vld [vmem:[#allocation6 + $0x18] sm:$0xff]  ;;  %v324_v12 = vpack.c.bf16 %v147_v8, %v146_v7  ;;  %v150_v14 = vld [vmem:[#allocation6 + $0x20] sm:$0xff]  ;;  %v151_v15 = vld [vmem:[#allocation6 + $0x28] sm:$0xff] }
  0x39   :  { %319 = vmatpush3.bf16.msra.mxu0 %v318_v5  ;;  %v327_v13 = vpack.c.bf16 %v149_v10, %v148_v9  ;;  %v59_v16 = vld [vmem:[#allocation2] sm:$0xff]  ;;  %v330_v17 = vpack.c.bf16 %v151_v15, %v150_v14  ;;  %v152_v18 = vld [vmem:[#allocation6 + $0x30] sm:$0xff]  ;;  %v154_v21 = vld [vmem:[#allocation6 + $0x40] sm:$0xff] }
  0x3a   :  { %320 = vmatprep.subr.bf16.mxu0 %v432_v0  ;;  %325 = vmatpush3.bf16.msra.mxu1 %v324_v12  ;;  %v153_v19 = vld [vmem:[#allocation6 + $0x38] sm:$0xff]  ;;  %v155_v22 = vld [vmem:[#allocation6 + $0x48] sm:$0xff]  ;;  %v156_v24 = vld [vmem:[#allocation6 + $0x50] sm:$0xff] }
  0x3b   :  { %326 = vmatprep.subr.bf16.mxu1 %v432_v0  ;;  %v333_v20 = vpack.c.bf16 %v153_v19, %v152_v18  ;;  %v336_v23 = vpack.c.bf16 %v155_v22, %v154_v21  ;;  %v157_v25 = vld [vmem:[#allocation6 + $0x58] sm:$0xff]  ;;  %v158_v27 = vld [vmem:[#allocation6 + $0x60] sm:$0xff]  ;;  %v159_v28 = vld [vmem:[#allocation6 + $0x68] sm:$0xff] }
  0x3c   :  { %v339_v26 = vpack.c.bf16 %v157_v25, %v156_v24  ;;  %v342_v29 = vpack.c.bf16 %v159_v28, %v158_v27  ;;  %v160_v30 = vld [vmem:[#allocation6 + $0x70] sm:$0xff]  ;;  %v161_v31 = vld [vmem:[#allocation6 + $0x78] sm:$0xff] }
  0x3d   :  { %322 = vmatpush3.bf16.msra.mxu0 %v321_v11  ;;  %v345_v32 = vpack.c.bf16 %v161_v31, %v160_v30  ;;  %v246_v33 = vld [vmem:[%s518_s2] ss:$0 sm:$0xff] }
  0x3e   :  { %328 = vmatpush3.bf16.msra.mxu1 %v327_v13  ;;  %v248_v38 = vld [vmem:[%s520_s4] ss:$0 sm:$0xff] }
  0x3f   :  { %329 = vmatprep.subr.bf16.mxu1 %v432_v0 }
  0x40   :  { %280 = vmatmul.mubr.msk.f32.vlgmr.msra.gmra.mrb[0].mxu0 %vm71_vm1, %v59_v16 }
  0x42   :  { %331 = vmatpush3.bf16.msra.mxu1 %v330_v17 }
  0x43   :  { %332 = vmatprep.subr.bf16.mxu1 %v432_v0 }
  0x46   :  { %334 = vmatpush3.bf16.msra.mxu1 %v333_v20 }
  0x47   :  { %335 = vmatprep.subr.bf16.mxu1 %v432_v0 }
  0x4a   :  { %337 = vmatpush3.bf16.msra.mxu1 %v336_v23 }
  0x4b   :  { %338 = vmatprep.subr.bf16.mxu1 %v432_v0 }
  0x4e   :  { %340 = vmatpush3.bf16.msra.mxu1 %v339_v26 }
  0x4f   :  { %341 = vmatprep.subr.bf16.mxu1 %v432_v0 }
  0x52   :  { %343 = vmatpush3.bf16.msra.mxu1 %v342_v29 }
  0x53   :  { %344 = vmatprep.subr.bf16.mxu1 %v432_v0 }
  0x56   :  { %346 = vmatpush3.bf16.msra.mxu1 %v345_v32 }
 0x113   :  { %v141_v34 = vpop.f32.mrb[0].mxu0 }
 0x114   :  { %v142_v35 = vadd.f32 %v246_v33, %v141_v34  ;;  %v281_v36 = vpop.f32.mrb[1].mxu0 }
 0x116   :  { %355 = vtanh.f32 %v142_v35 }
 0x120   :  { %v356_v37 = vpop.eup %355 }
 0x121   :  { %315 = vmatmul.mubr.f32.vlgmr.msra.gmra.mrb[0].mxu1 %v356_v37 }
 0x1f4   :  { %v235_v39 = vpop.f32.mrb[0].mxu1 }
 0x1f5   :  { %v236_v40 = vadd.f32 %v248_v38, %v235_v39  ;;  %v316_v41 = vpop.f32.mrb[1].mxu1 }
 0x1f7   :  { %239 = vst [vmem:[%s521_s5] sm:$0xff] %v236_v40 }
 0x1f8   :  { %244 = vsyncpa [#allocation3], 1 }
 0x1f9   :  { %245 = vsyncpa [#allocation5], 1 }

</bundles_post_ra>
